<compile_context>
chip_gen: v7x
topology: tpu7x:2x2x1
jax: 0.10.0
libtpu: 0.0.40
codegen_flags: <defaults>
</compile_context>

<pallas_src>
import math

import jax
import jax.numpy as jnp
from jax.experimental import pallas as pl
from jax.experimental.pallas import tpu as pltpu


IN_FEATURES = 24
OUT_FEATURES = 3
OUT_PAD = 128          # lane-dense output width (multiple of 128 -> unmasked vst)


def _round_up(n, m):
    return ((n + m - 1) // m) * m


def fc_kernel(x_ref, w_ref, b_ref, o_ref):
    # x_ref: (TB, 24), w_ref: (24, 128), b_ref: (1, 128), o_ref: (TB, 128).
    # One MXU pass + one (broadcast) bias add per batch tile; the kernel is a
    # pure HBM stream of x with double-buffered DMA from the BlockSpec grid.
    o_ref[...] = (
        jnp.dot(x_ref[...], w_ref[...], preferred_element_type=jnp.float32)
        + b_ref[...]
    ).astype(o_ref.dtype)


def fc_forward(x, w_fc, b_fc, w_out, b_out, *, tb=1024):
    """x: (B, 24) float32. Weights in (in, out) layout; biases (1, out). Returns (B, 3)."""
    B, F = x.shape
    assert F == IN_FEATURES

    # ---- Fold the 4 affine layers into a single (24, 3) affine map (in XLA). ----
    # y = x @ W^3 @ Wo + ((b@W^2 + b@W + b) @ Wo + bo)
    w_eff = w_fc @ (w_fc @ (w_fc @ w_out))                 # (24, 3)
    t = b_fc
    t = t @ w_fc + b_fc
    t = t @ w_fc + b_fc
    b_eff = t @ w_out + b_out                              # (1, 3)

    # Zero-pad the output dim to 128 so kernel stores are lane-dense (bit-exact
    # after slicing [:, :3]).
    w_pad = jnp.zeros((F, OUT_PAD), w_eff.dtype).at[:, :OUT_FEATURES].set(w_eff)
    b_pad = jnp.zeros((1, OUT_PAD), b_eff.dtype).at[:, :OUT_FEATURES].set(b_eff)

    # ---- Batch tiling: 8-aligned row tile, pad B up to a multiple of it. ----
    # VMEM per grid step at tb=1024 (double-buffered):
    #   x: 2*1024*24*4 ~= 192 KiB, out: 2*1024*128*4 = 1 MiB, weights ~12.5 KiB
    # -> far under the 32 MiB default scoped VMEM on v5e/v6e/v7x, so no
    #    vmem_limit_bytes override is needed (and it fits v7x's 64 MiB VMEM).
    tb_eff = min(tb, _round_up(B, 8))
    b_rows = _round_up(B, tb_eff)
    x_in = x if b_rows == B else jnp.pad(x, ((0, b_rows - B), (0, 0)))

    grid = (pl.cdiv(b_rows, tb_eff),)

    out = pl.pallas_call(
        fc_kernel,
        out_shape=jax.ShapeDtypeStruct((b_rows, OUT_PAD), x.dtype),
        grid=grid,
        in_specs=[
            pl.BlockSpec((tb_eff, F), lambda i: (i, 0)),      # x: streamed tiles
            pl.BlockSpec((F, OUT_PAD), lambda i: (0, 0)),     # W: VMEM-resident
            pl.BlockSpec((1, OUT_PAD), lambda i: (0, 0)),     # b: VMEM-resident
        ],
        out_specs=pl.BlockSpec((tb_eff, OUT_PAD), lambda i: (i, 0)),
        compiler_params=pltpu.CompilerParams(
            dimension_semantics=("parallel",),   # megacore-shard batch on v7x
        ),
    )(x_in, w_pad, b_pad)

    return out[:B, :OUT_FEATURES]


def init_params(key):
    """Deterministic init mimicking torch.nn.Linear default U(-1/sqrt(fan_in), 1/sqrt(fan_in))."""
    k1, k2, k3, k4 = jax.random.split(key, 4)
    bound = 1.0 / math.sqrt(IN_FEATURES)
    # Stored directly in (in, out) layout for the kernel (torch stores (out, in)).
    w_fc = jax.random.uniform(k1, (IN_FEATURES, IN_FEATURES), jnp.float32, -bound, bound)
    b_fc = jax.random.uniform(k2, (1, IN_FEATURES), jnp.float32, -bound, bound)
    w_out = jax.random.uniform(k3, (IN_FEATURES, OUT_FEATURES), jnp.float32, -bound, bound)
    b_out = jax.random.uniform(k4, (1, OUT_FEATURES), jnp.float32, -bound, bound)
    return w_fc, b_fc, w_out, b_out


def fc_reference(x, w_fc, b_fc, w_out, b_out):
    # Unfolded chain, matching the PyTorch forward literally.
    h = x
    for _ in range(3):
        h = h @ w_fc + b_fc
    return h @ w_out + b_out


if __name__ == "__main__":
    key = jax.random.PRNGKey(0)
    k_x, k_p = jax.random.split(key)

    B = 64
    x = jax.random.normal(k_x, (B, IN_FEATURES), jnp.float32)
    w_fc, b_fc, w_out, b_out = init_params(k_p)

    out = fc_forward(x, w_fc, b_fc, w_out, b_out)
    out = jax.block_until_ready(out)

    ref = fc_reference(x, w_fc, b_fc, w_out, b_out)
    assert out.shape == (B, OUT_FEATURES), out.shape
    assert jnp.allclose(out, ref, atol=1e-4, rtol=1e-4), "mismatch vs reference"

    # Ragged batch (exercises the pad-to-tile path).
    B2 = 50
    x2 = jax.random.normal(k_x, (B2, IN_FEATURES), jnp.float32)
    out2 = jax.block_until_ready(fc_forward(x2, w_fc, b_fc, w_out, b_out))
    ref2 = fc_reference(x2, w_fc, b_fc, w_out, b_out)
    assert out2.shape == (B2, OUT_FEATURES), out2.shape
    assert jnp.allclose(out2, ref2, atol=1e-4, rtol=1e-4), "mismatch vs reference (ragged B)"

    print("KERNEL_OK")
</pallas_src>

<mosaic_0001>
module attributes {stable_mosaic.version = 11 : i64} {
  func.func @fc_kernel(%arg0: i32, %arg1: memref<64x24xf32, #tpu.memory_space<vmem>>, %arg2: memref<24x128xf32, #tpu.memory_space<vmem>>, %arg3: memref<1x128xf32, #tpu.memory_space<vmem>>, %arg4: memref<64x128xf32, #tpu.memory_space<vmem>>) attributes {dimension_semantics = [#tpu.dimension_semantics<parallel>], iteration_bounds = array<i64: 1>, scalar_prefetch = 0 : i64, scratch_operands = 0 : i64, tpu.core_type = #tpu.core_type<tc>, window_params = [{transform_indices = @transform_0, window_bounds = array<i64: 64, 24>}, {pipeline_mode = #tpu.pipeline_mode<synchronous>, transform_indices = @transform_1, window_bounds = array<i64: 24, 128>}, {pipeline_mode = #tpu.pipeline_mode<synchronous>, transform_indices = @transform_2, window_bounds = array<i64: 1, 128>}, {transform_indices = @transform_3, window_bounds = array<i64: 64, 128>}]} {
    %c0 = arith.constant 0 : index
    %c0_0 = arith.constant 0 : index
    %0 = vector.load %arg1[%c0, %c0_0] : memref<64x24xf32, #tpu.memory_space<vmem>>, vector<64x24xf32>
    %c0_1 = arith.constant 0 : index
    %c0_2 = arith.constant 0 : index
    %1 = vector.load %arg2[%c0_1, %c0_2] : memref<24x128xf32, #tpu.memory_space<vmem>>, vector<24x128xf32>
    %cst = arith.constant dense<0.000000e+00> : vector<64x128xf32>
    %2 = tpu.matmul %0, %1, %cst {dimension_numbers = #tpu.dot_dimension_numbers<[1], [0], [0], [1], [0, 0, 1, 1], [], []>} : vector<64x24xf32>, vector<24x128xf32>, vector<64x128xf32> -> vector<64x128xf32>
    %c0_3 = arith.constant 0 : index
    %c0_4 = arith.constant 0 : index
    %3 = vector.load %arg3[%c0_3, %c0_4] : memref<1x128xf32, #tpu.memory_space<vmem>>, vector<1x128xf32>
    %4 = vector.broadcast %3 : vector<1x128xf32> to vector<64x128xf32>
    %5 = arith.addf %2, %4 : vector<64x128xf32>
    %c0_5 = arith.constant 0 : index
    %c0_6 = arith.constant 0 : index
    %6 = vector.load %arg4[%c0_5, %c0_6] : memref<64x128xf32, #tpu.memory_space<vmem>>, vector<64x128xf32>
    tpu.vector_store %arg4[%c0_5, %c0_6], %5 {strides = array<i32>} : memref<64x128xf32, #tpu.memory_space<vmem>>, vector<64x128xf32>,
    return
  }
  func.func @transform_0(%arg0: i32) -> (i32, i32) {
    %c0_i32 = arith.constant 0 : i32
    %c0_i32_0 = arith.constant 0 : i32
    return %arg0, %c0_i32 : i32, i32
  }
  func.func @transform_1(%arg0: i32) -> (i32, i32) {
    %c0_i32 = arith.constant 0 : i32
    %c0_i32_0 = arith.constant 0 : i32
    %c0_i32_1 = arith.constant 0 : i32
    return %c0_i32, %c0_i32_0 : i32, i32
  }
  func.func @transform_2(%arg0: i32) -> (i32, i32) {
    %c0_i32 = arith.constant 0 : i32
    %c0_i32_0 = arith.constant 0 : i32
    %c0_i32_1 = arith.constant 0 : i32
    return %c0_i32, %c0_i32_0 : i32, i32
  }
  func.func @transform_3(%arg0: i32) -> (i32, i32) {
    %c0_i32 = arith.constant 0 : i32
    %c0_i32_0 = arith.constant 0 : i32
    return %arg0, %c0_i32 : i32, i32
  }
}

</mosaic_0001>

<bundles_post_ra>
// kernel: tpu_custom_call.1
= control target key start
LH: loop header
LB: loop body
LE: loop exit
PB: predicated region body
PF: predicated region fallthrough
CT: control target
= control target key end

     0   :  { %vm33_vm0 = vcmask 195584   ;;  %s339_s0 = inlined_call_operand.vmem [shape: f32[64,24], index: 0, kind: input, shape index: {}]   ;;  %s340_s1 = inlined_call_operand.vmem [shape: f32[24,128], index: 1, kind: input, shape index: {}]   ;;  %s341_s2 = inlined_call_operand.vmem [shape: f32[1,128], index: 2, kind: input, shape index: {}]   ;;  %s342_s3 = inlined_call_operand.hbm [shape: f32[64,128], index: 3, kind: output, shape index: {}]  }
   0x1   :  { %v23_v0 = vld [vmem:[%s340_s1] sm:$0xff]  ;;  %v24_v1 = vld [vmem:[%s340_s1 + $0x8] sm:$0xff]  ;;  %v25_v5 = vld [vmem:[%s340_s1 + $0x10] sm:$0xff] }
   0x2   :  { %v225_v2 = vpack.c.bf16 %v24_v1, %v23_v0  ;;  %v15_v3 = vld [vmem:[%s339_s0] sm:$0xff] }
   0x3   :  { %v19_v4 = vld [vmem:[%s339_s0 + $0x20] sm:$0xff]  ;;  %213 = vmatprep.mubr.msk.f32.mxu0 %vm33_vm0, %v15_v3 }
   0x4   :  { %219 = vmatprep.mubr.msk.f32.mxu1 %vm33_vm0, %v19_v4  ;;  %226 = vmatprep.subr.bf16.mxu0 %v225_v2 }
   0x5   :  { %229 = vmatprep.subr.bf16.mxu1 %v225_v2 }
   0x6   :  { %8 = vsyncpa [#allocation3], 0  ;;  %228 = vmatpush3.bf16.msra.mxu0 %v225_v2  ;;  %231 = vmatpush3.bf16.msra.mxu1 %v225_v2  ;;  %v16_v6 = vld [vmem:[%s339_s0 + $0x8] sm:$0xff]  ;;  %v17_v8 = vld [vmem:[%s339_s0 + $0x10] sm:$0xff]  ;;  %s260_s8 = smov [#allocation2]  }
   0x7   :  { %211 = vmatprep.subr.mxu0 %v25_v5  ;;  %230 = vmatprep.subr.mxu1 %v25_v5  ;;  %v20_v7 = vld [vmem:[%s339_s0 + $0x28] sm:$0xff]  ;;  %v21_v9 = vld [vmem:[%s339_s0 + $0x30] sm:$0xff]  ;;  %v18_v10 = vld [vmem:[%s339_s0 + $0x18] sm:$0xff]  ;;  %s176_s9 = sshll.u32 %s260_s8, 4  ;;  %s177_s9 = int_to_ptr.vmem [resolvable:$true] %s176_s9 }
   0x8   :  { %v22_v11 = vld [vmem:[%s339_s0 + $0x38] sm:$0xff]  ;;  %v187_v12 = vld [vmem:[%s341_s2] ss:$0 sm:$0xff]  ;;  %s236_s0 = scalar_lea.vmem %s177_s9, 1024  ;;  %p241_p1 = scmp.lt.s32.totalorder %s177_s9, %s177_s9 }
   0x9   :  { %p237_p0 = scmp.ne.s32.totalorder %s177_s9, %s236_s0  ;;  %p242_p2 = scmp.lt.s32.totalorder %s236_s0, %s236_s0 }
   0xa   :  { %212 = vmatpush3.msra.mxu0 %v25_v5  ;;  %232 = vmatpush3.msra.mxu1 %v25_v5 }
   0xb   :  { %214 = vmatmul.mubr.msk.f32.vlgmr.msra.gmra.mrb[0].mxu0 %vm33_vm0, %v16_v6  ;;  %220 = vmatmul.mubr.msk.f32.vlgmr.msra.gmra.mrb[0].mxu1 %vm33_vm0, %v20_v7  ;;  %p243_p3 = por %p242_p2, %p241_p1 }
   0xc   :  { %216 = vmatprep.mubr.msk.f32.mxu0 %vm33_vm0, %v17_v8  ;;  %222 = vmatprep.mubr.msk.f32.mxu1 %vm33_vm0, %v21_v9 }
   0xd   :  { %p244_p4 = pnand %p243_p3, %p237_p0 }
   0xf   :  { %217 = vmatmul.mubr.msk.f32.gmra.mrb[2].mxu0 %vm33_vm0, %v18_v10  ;;  %223 = vmatmul.mubr.msk.f32.gmra.mrb[2].mxu1 %vm33_vm0, %v22_v11 }
  0xde   :  { %v215_v13 = vpop.f32.mrb[0].mxu0  ;;  %v221_v14 = vpop.f32.mrb[0].mxu1 }
  0xdf   :  { %v130_v15 = vadd.f32 %v215_v13, %v187_v12  ;;  %v150_v16 = vadd.f32 %v221_v14, %v187_v12  ;;  %v124_v17 = vpop.f32.mrb[1].mxu0  ;;  %v144_v18 = vpop.f32.mrb[1].mxu1 }
  0xe0   :  { %v125_v19 = vadd.f32 %v187_v12, %v124_v17  ;;  %v145_v20 = vadd.f32 %v187_v12, %v144_v18 }
  0xe1   :  { %164 = vst [vmem:[#allocation2 + $0x8] sm:$0xff] %v130_v15  ;;  %168 = vst [vmem:[#allocation2 + $0x28] sm:$0xff] %v150_v16 }
  0xe2   :  { %163 = vst [vmem:[#allocation2] sm:$0xff] %v125_v19  ;;  %167 = vst [vmem:[#allocation2 + $0x20] sm:$0xff] %v145_v20  ;;  %v218_v21 = vpop.f32.mrb[2].mxu0  ;;  %v224_v22 = vpop.f32.mrb[2].mxu1 }
  0xe3   :  { %v140_v23 = vadd.f32 %v218_v21, %v187_v12  ;;  %v160_v24 = vadd.f32 %v224_v22, %v187_v12  ;;  %v134_v25 = vpop.f32.mrb[3].mxu0  ;;  %v154_v26 = vpop.f32.mrb[3].mxu1 }
  0xe4   :  { %v135_v27 = vadd.f32 %v187_v12, %v134_v25  ;;  %v155_v28 = vadd.f32 %v187_v12, %v154_v26 }
  0xe5   :  { %166 = vst [vmem:[#allocation2 + $0x18] sm:$0xff] %v140_v23  ;;  %170 = vst [vmem:[#allocation2 + $0x38] sm:$0xff] %v160_v24 }
  0xe6   :  { %165 = vst [vmem:[#allocation2 + $0x10] sm:$0xff] %v135_v27  ;;  %169 = vst [vmem:[#allocation2 + $0x30] sm:$0xff] %v155_v28 }
  0xe7   :  { %247 = shalt.err (!%p244_p4)
}
  0xe8   :  { %s248_s11 = scalar_lea.hbm %s342_s3, 1024 }
  0xe9   :  { %p249_p5 = scmp.ne.s32.totalorder %s342_s3, %s248_s11  ;;  %p252_p6 = scmp.lt.u32.totalorder %s248_s11, %s342_s3 }
  0xeb   :  { %p254_p7 = pnand %p252_p6, %p249_p5 }
  0xed   :  { %257 = shalt.err (!%p254_p7)
}
  0xee   :  { %s261_s16 = smov 128   ;;  %s262_s17 = smov 8  }
  0xef   :  { %182 = dma.vmem_to_hbm [thread:$0]  %s177_s9, 1024, %s342_s3, [#allocation3], %s261_s16, %s261_s16, %s262_s17  }
  0xf0   :  { %258 = dma.done.wait [#allocation3], 1024  }
  0xf1   :  { %259 = vsyncadd [#allocation3], 4294966272 }
  0xf2   :  { %186 = vsyncpa [#allocation3], 1 }

</bundles_post_ra>
